<compile_context>
chip_gen: v6e
topology: v6e:2x2x1
jax: 0.10.0
libtpu: 0.0.40
codegen_flags: <defaults>
</compile_context>

<pallas_src>
import jax
import jax.numpy as jnp
import numpy as np
from jax.experimental import pallas as pl
from jax.experimental.pallas import tpu as pltpu


_TARGET_BLOCK_BYTES = 2 * 1024 * 1024   # ~2 MiB blocks: past ~1-4 MiB a
_MAX_LANE_TILE = 2048                   # mem-bound op gains nothing, and
                                        # 2 bufs * (in+out) << scoped VMEM.


def _round_up(x, m):
    return ((x + m - 1) // m) * m


# ----------------------------- kernels -------------------------------------

def _fused_affine_rows_kernel(x_ref, scale_ref, shift_ref, o_ref):
    # x_ref / o_ref: (TB, M, TN) tiles.
    # scale_ref / shift_ref: (1, M, 1) f32, same block every grid step
    # (resident), broadcast along batch sublanes and lanes inside the kernel.
    x = x_ref[...].astype(jnp.float32)
    o_ref[...] = (x * scale_ref[...] + shift_ref[...]).astype(o_ref.dtype)


def _fused_affine_scalar_kernel(sm_ref, x_ref, o_ref):
    # sm_ref: (1, 2) f32 in SMEM -> [scale, shift].  x_ref/o_ref: (TM, TN).
    x = x_ref[...].astype(jnp.float32)
    o_ref[...] = (x * sm_ref[0, 0] + sm_ref[0, 1]).astype(o_ref.dtype)


# --------------------------- pallas wrappers --------------------------------

def _fused_affine_rows(v, scale, shift):
    """v: (B, M, N); out[b, m, n] = v[b, m, n] * scale[m] + shift[m]."""
    B, M, N = v.shape
    itemsize = v.dtype.itemsize

    # Lane tile: full last dim when it fits (no ragged lanes, fully dense
    # stores); otherwise a 128-multiple, ragged last block handled by Pallas.
    lane_budget = (2 * _TARGET_BLOCK_BYTES) // max(M * itemsize, 1)
    if N <= _MAX_LANE_TILE and N <= max(lane_budget, 128):
        TN = N
    else:
        TN = min(_MAX_LANE_TILE, max(128, (lane_budget // 128) * 128))
    grid_n = pl.cdiv(N, TN)

    per_batch = M * TN * itemsize
    TB = max(1, min(B, _TARGET_BLOCK_BYTES // max(per_batch, 1)))
    grid_b = pl.cdiv(B, TB)
    # Keep >=2 parallel grid steps when there is enough work (2 TCs on v7x).
    if grid_b * grid_n == 1 and B > 1:
        TB = (B + 1) // 2
        grid_b = pl.cdiv(B, TB)

    scale3 = scale.astype(jnp.float32).reshape(1, M, 1)
    shift3 = shift.astype(jnp.float32).reshape(1, M, 1)

    total = B * M * N
    cost = pl.CostEstimate(flops=2 * total, transcendentals=0,
                           bytes_accessed=2 * total * itemsize)

    return pl.pallas_call(
        _fused_affine_rows_kernel,
        out_shape=jax.ShapeDtypeStruct((B, M, N), v.dtype),
        grid_spec=pltpu.PrefetchScalarGridSpec(
            num_scalar_prefetch=0,
            grid=(grid_b, grid_n),
            in_specs=[
                pl.BlockSpec((TB, M, TN), lambda i, j: (i, 0, j)),
                pl.BlockSpec((1, M, 1), lambda i, j: (0, 0, 0)),
                pl.BlockSpec((1, M, 1), lambda i, j: (0, 0, 0)),
            ],
            out_specs=pl.BlockSpec((TB, M, TN), lambda i, j: (i, 0, j)),
        ),
        compiler_params=pltpu.CompilerParams(
            dimension_semantics=("parallel", "parallel")),
        cost_estimate=cost,
    )(v, scale3, shift3)


def _fused_affine_scalar(v2, scale, shift):
    """v2: (R, N); out = v2 * scale + shift with scalar scale/shift."""
    R, N = v2.shape
    itemsize = v2.dtype.itemsize
    sub = 8 * max(1, 4 // itemsize)       # sublane multiple: 8 f32 / 16 bf16

    TN = N if N <= _MAX_LANE_TILE else _MAX_LANE_TILE
    grid_n = pl.cdiv(N, TN)

    rows_budget = _TARGET_BLOCK_BYTES // max(TN * itemsize, 1)
    if rows_budget >= R:
        TM = R                             # full dim: always legal
    else:
        TM = max(sub, (rows_budget // sub) * sub)
    grid_m = pl.cdiv(R, TM)
    # Keep >=2 parallel grid steps when there is enough work.
    if grid_m * grid_n == 1 and R > sub:
        half = _round_up((R + 1) // 2, sub)
        if half < R:
            TM = half
            grid_m = pl.cdiv(R, TM)

    sm = jnp.concatenate([scale.astype(jnp.float32).reshape(1),
                          shift.astype(jnp.float32).reshape(1)]).reshape(1, 2)

    total = R * N
    cost = pl.CostEstimate(flops=2 * total, transcendentals=0,
                           bytes_accessed=2 * total * itemsize)

    return pl.pallas_call(
        _fused_affine_scalar_kernel,
        out_shape=jax.ShapeDtypeStruct((R, N), v2.dtype),
        grid_spec=pltpu.PrefetchScalarGridSpec(
            num_scalar_prefetch=0,
            grid=(grid_m, grid_n),
            in_specs=[
                pl.BlockSpec((1, 2), lambda i, j: (0, 0),
                             memory_space=pltpu.MemorySpace.SMEM),
                pl.BlockSpec((TM, TN), lambda i, j: (i, j)),
            ],
            out_specs=pl.BlockSpec((TM, TN), lambda i, j: (i, j)),
        ),
        compiler_params=pltpu.CompilerParams(
            dimension_semantics=("parallel", "parallel")),
        cost_estimate=cost,
    )(sm, v2)


# ------------------------- ChainedTransform.forward -------------------------

def chained_transform(values, transforms, num_outputs):
    """ChainedTransform.forward: apply `transforms` right-to-left.

    Each transform is ("mul", arr) or ("add", arr) with arr of shape
    (num_outputs,): a per-output affine broadcasting along the outcome axis
    (dim -2) when num_outputs > 1, a scalar when num_outputs == 1.  The affine
    chain is folded into a single (scale, shift) pair and run as one fused
    Pallas HBM pass.
    """
    # TODO(synk): non-affine member transforms (e.g. SineCosineTransform)
    # cannot be folded into a single multiply-add; they would need their own
    # fused kernel stage.
    scale = jnp.ones((num_outputs,), dtype=jnp.float32)
    shift = jnp.zeros((num_outputs,), dtype=jnp.float32)
    # Process in application order (right-to-left); running affine y = s*x + b.
    for kind, arr in reversed(list(transforms)):
        a = arr.astype(jnp.float32).reshape(num_outputs)
        if kind == "mul":
            scale = scale * a
            shift = shift * a
        elif kind == "add":
            shift = shift + a
        else:
            raise ValueError(f"unknown transform kind: {kind!r}")

    orig_shape = values.shape
    if num_outputs == 1:
        N = orig_shape[-1]
        out = _fused_affine_scalar(values.reshape(-1, N), scale, shift)
        return out.reshape(orig_shape)

    assert orig_shape[-2] == num_outputs
    v3 = values.reshape(-1, num_outputs, orig_shape[-1])
    out = _fused_affine_rows(v3, scale, shift)
    return out.reshape(orig_shape)


def _reference(values, transforms, num_outputs):
    """Pure-JAX reference: apply each transform literally, right-to-left."""
    out = values
    for kind, arr in reversed(list(transforms)):
        if num_outputs == 1:
            a = arr.reshape(())
        else:
            a = arr.reshape(num_outputs, 1)     # broadcast along dim -2
        out = out * a if kind == "mul" else out + a
    return out


if __name__ == "__main__":
    key = jax.random.PRNGKey(0)
    k1, k2, k3 = jax.random.split(key, 3)

    # ---- multi-output chain over (batch, num_outputs, num_points) ----
    # transforms applied right-to-left: mul(stdvs) -> add(means) -> mul(outsc)
    B, M, N = 2, 8, 200                    # N deliberately NOT a 128 multiple
    values = jax.random.normal(k1, (B, M, N), dtype=jnp.float32)
    stdvs = jnp.linspace(0.5, 2.0, M, dtype=jnp.float32)
    means = jnp.linspace(-1.0, 1.0, M, dtype=jnp.float32)
    outscale = jnp.full((M,), 1.3, dtype=jnp.float32)
    transforms = (("mul", outscale), ("add", means), ("mul", stdvs))

    out = chained_transform(values, transforms, num_outputs=M)
    out = jax.block_until_ready(out)
    ref = _reference(values, transforms, num_outputs=M)
    np.testing.assert_allclose(np.asarray(out), np.asarray(ref),
                               rtol=1e-5, atol=1e-5)

    # ---- single-output chain (scalar affine) over (batch, num_points) ----
    values1 = jax.random.normal(k2, (3, 200), dtype=jnp.float32)
    t1 = (("add", jnp.array([0.25], dtype=jnp.float32)),
          ("mul", jnp.array([1.75], dtype=jnp.float32)))
    out1 = chained_transform(values1, t1, num_outputs=1)
    out1 = jax.block_until_ready(out1)
    ref1 = _reference(values1, t1, num_outputs=1)
    np.testing.assert_allclose(np.asarray(out1), np.asarray(ref1),
                               rtol=1e-5, atol=1e-5)

    # ---- single-output, row count forces a ragged row grid (no padding) ----
    values2 = jax.random.normal(k3, (257, 384), dtype=jnp.float32)
    t2 = (("mul", jnp.array([0.5], dtype=jnp.float32)),
          ("add", jnp.array([2.0], dtype=jnp.float32)))
    out2 = chained_transform(values2, t2, num_outputs=1)
    out2 = jax.block_until_ready(out2)
    ref2 = _reference(values2, t2, num_outputs=1)
    np.testing.assert_allclose(np.asarray(out2), np.asarray(ref2),
                               rtol=1e-5, atol=1e-5)

    print("KERNEL_OK")
</pallas_src>

<mosaic_0001>
module attributes {stable_mosaic.version = 11 : i64} {
  func.func @_fused_affine_rows_kernel(%arg0: i32, %arg1: i32, %arg2: memref<1x8x200xf32, #tpu.memory_space<vmem>>, %arg3: memref<1x8x1xf32, #tpu.memory_space<vmem>>, %arg4: memref<1x8x1xf32, #tpu.memory_space<vmem>>, %arg5: memref<1x8x200xf32, #tpu.memory_space<vmem>>) attributes {dimension_semantics = [#tpu.dimension_semantics<parallel>, #tpu.dimension_semantics<parallel>], iteration_bounds = array<i64: 2, 1>, scalar_prefetch = 0 : i64, scratch_operands = 0 : i64, tpu.core_type = #tpu.core_type<tc>, window_params = [{transform_indices = @transform_0, window_bounds = array<i64: 1, 8, 200>}, {pipeline_mode = #tpu.pipeline_mode<synchronous>, transform_indices = @transform_1, window_bounds = array<i64: 1, 8, 1>}, {pipeline_mode = #tpu.pipeline_mode<synchronous>, transform_indices = @transform_2, window_bounds = array<i64: 1, 8, 1>}, {transform_indices = @transform_3, window_bounds = array<i64: 1, 8, 200>}]} {
    %c0 = arith.constant 0 : index
    %c0_0 = arith.constant 0 : index
    %c0_1 = arith.constant 0 : index
    %0 = vector.load %arg2[%c0, %c0_0, %c0_1] : memref<1x8x200xf32, #tpu.memory_space<vmem>>, vector<1x8x200xf32>
    %c0_2 = arith.constant 0 : index
    %c0_3 = arith.constant 0 : index
    %c0_4 = arith.constant 0 : index
    %1 = vector.load %arg3[%c0_2, %c0_3, %c0_4] : memref<1x8x1xf32, #tpu.memory_space<vmem>>, vector<1x8x1xf32>
    %2 = vector.broadcast %1 : vector<1x8x1xf32> to vector<1x8x200xf32>
    %3 = arith.mulf %0, %2 : vector<1x8x200xf32>
    %c0_5 = arith.constant 0 : index
    %c0_6 = arith.constant 0 : index
    %c0_7 = arith.constant 0 : index
    %4 = vector.load %arg4[%c0_5, %c0_6, %c0_7] : memref<1x8x1xf32, #tpu.memory_space<vmem>>, vector<1x8x1xf32>
    %5 = vector.broadcast %4 : vector<1x8x1xf32> to vector<1x8x200xf32>
    %6 = arith.addf %3, %5 : vector<1x8x200xf32>
    %c0_8 = arith.constant 0 : index
    %c0_9 = arith.constant 0 : index
    %c0_10 = arith.constant 0 : index
    %7 = vector.load %arg5[%c0_8, %c0_9, %c0_10] : memref<1x8x200xf32, #tpu.memory_space<vmem>>, vector<1x8x200xf32>
    tpu.vector_store %arg5[%c0_8, %c0_9, %c0_10], %6 {strides = array<i32>} : memref<1x8x200xf32, #tpu.memory_space<vmem>>, vector<1x8x200xf32>,
    return
  }
  func.func @transform_0(%arg0: i32, %arg1: i32) -> (i32, i32, i32) {
    %c0_i32 = arith.constant 0 : i32
    %c0_i32_0 = arith.constant 0 : i32
    return %arg0, %c0_i32, %arg1 : i32, i32, i32
  }
  func.func @transform_1(%arg0: i32, %arg1: i32) -> (i32, i32, i32) {
    %c0_i32 = arith.constant 0 : i32
    %c0_i32_0 = arith.constant 0 : i32
    %c0_i32_1 = arith.constant 0 : i32
    %c0_i32_2 = arith.constant 0 : i32
    return %c0_i32, %c0_i32_0, %c0_i32_1 : i32, i32, i32
  }
  func.func @transform_2(%arg0: i32, %arg1: i32) -> (i32, i32, i32) {
    %c0_i32 = arith.constant 0 : i32
    %c0_i32_0 = arith.constant 0 : i32
    %c0_i32_1 = arith.constant 0 : i32
    %c0_i32_2 = arith.constant 0 : i32
    return %c0_i32, %c0_i32_0, %c0_i32_1 : i32, i32, i32
  }
  func.func @transform_3(%arg0: i32, %arg1: i32) -> (i32, i32, i32) {
    %c0_i32 = arith.constant 0 : i32
    %c0_i32_0 = arith.constant 0 : i32
    return %arg0, %c0_i32, %arg1 : i32, i32, i32
  }
}

</mosaic_0001>

<bundles_post_ra>
// kernel: tpu_custom_call.1
= control target key start
LH: loop header
LB: loop body
LE: loop exit
PB: predicated region body
PF: predicated region fallthrough
CT: control target
= control target key end

     0   :  { %8 = vsyncpa [#allocation3], 0  ;;  %s689_s0 = inlined_call_operand.hbm [shape: f32[2,8,200], index: 0, kind: input, shape index: {}]   ;;  %s690_s1 = inlined_call_operand.vmem [shape: f32[1,8,1], index: 1, kind: input, shape index: {}]   ;;  %s691_s2 = inlined_call_operand.vmem [shape: f32[1,8,1], index: 2, kind: input, shape index: {}]   ;;  %s692_s3 = inlined_call_operand.hbm [shape: f32[2,8,200], index: 3, kind: output, shape index: {}]  }
   0x1   :  { %10 = vsyncpa [#allocation3 + $0x1], 0 }
   0x2   :  { %11 = vsyncpa [#allocation4], 0 }
   0x3   :  { %13 = vsyncpa [#allocation4 + $0x1], 0  ;;  %s543_s12 = smov 0   ;;  %s545_s13 = smov 0  }
   0x4   :  { %s547_s14 = smov 0   ;;  %s549_s15 = smov 0  }
   0x5   :  { %s551_s16 = smov 0   ;;  %s553_s17 = smov 0  }
   0x6 LB: > { %s329_s18 = sadd.s32 4294967295, %s518_s17   ;;  %s330_s19 = sadd.s32 4294967294, %s518_s17   ;;  %s518_s17 = sphi %s553_s17, %s19_s17   ;;  %s514_s16 = sphi %s551_s16, %s704_s16   ;;  %s510_s15 = sphi %s549_s15, %s703_s15   ;;  %s506_s14 = sphi %s547_s14, %s702_s14   ;;  %s502_s13 = sphi %s545_s13, %s701_s13   ;;  %s498_s12 = sphi %s543_s12, %s700_s12  }
   0x7   : > { %s31_s20 = sadd.s32 1, %s514_s16  ;;  %s40_s21 = sadd.s32 1, %s506_s14 }
   0x8   : > { %p33_p0 = scmp.ge.s32.totalorder %s31_s20, 2  ;;  %p47_p1 = scmp.ne.s32.totalorder %s506_s14, %s502_s13 }
   0x9   : > { %p48_p2 = scmp.eq.s32.totalorder %s518_s17, 0  ;;  %p53_p3 = scmp.ne.s32.totalorder %s502_s13, %s498_s12 }
   0xa   : > { %s706_s20 = smov (%p33_p0, %s31_s20), 0  ;;  %p54_p5 = scmp.eq.s32.totalorder %s329_s18, 0 }
   0xb   : > { %p584_p4 = por %p48_p2, %p47_p1  ;;  %s35_s23 = ssub.s32 %s514_s16, %s706_s20 }
   0xc   : > { %p121_p6 = scmp.eq.s32.totalorder %s329_s18, 1  ;;  %p38_p7 = scmp.eq.s32.totalorder %s35_s23, 0 }
   0xd   : > { %p590_p8 = por %p54_p5, %p53_p3  ;;  %p127_p10 = scmp.eq.s32.totalorder %s330_s19, 1 }
   0xe   : > { %p594_p9 = por %p121_p6, %p47_p1  ;;  %p358_p13 = scmp.lt.s32.totalorder %s518_s17, 2 }
   0xf   : > { %s599_s26 = scalar_select %p38_p7, %s506_s14, %s40_s21  }
  0x10   : > { %p601_p11 = por %p127_p10, %p53_p3  ;;  %s153_s28 = sand.u32 1, %s506_s14  }
  0x11   : > { %s333_s29 = sshll.u32 %s153_s28, 4  ;;  %s344_s30 = sshll.u32 %s514_s16, 8 }
  0x12   : > { %s696_s27 = scalar_select %p601_p11, 1, 0 }
  0x13   : > { %s165_s6 = scalar_lea.hbm %s689_s0, %s344_s30  ;;  %s157_s7 = scalar_lea.vmem [#allocation2], %s333_s29 }
  0x14   : > { %s167_s8 = sshll.u32 %s157_s7, 4  ;;  %p614_p0 = pnand %p358_p13, %p584_p4  ;;  %s168_s8 = int_to_ptr.vmem [resolvable:$true] %s167_s8 }
  0x15   : > { %p336_p1 = scmp.ge.s32.totalorder %s518_s17, 1  ;;  %p172_p2 = scmp.lt.s32.totalorder %s518_s17, 3 }
  0x16   : > { %s154_s10 = scalar_lea.sflag [#allocation3], %s153_s28  ;;  %p412_p3 = pneg %p614_p0 }
  0x17   : > { %s423_s11 = scalar_lea.vmem %s168_s8, 256  ;;  %s520_s18 = smov [#allocation2]  }
  0x18   : > { %p424_p5 = scmp.ne.s32.totalorder %s168_s8, %s423_s11  ;;  %s428_s19 = sshll.u32 %s520_s18, 4  ;;  %s429_s19 = int_to_ptr.vmem [resolvable:$false] %s428_s19 }
  0x19   : > { %s430_s21 = scalar_lea.vmem %s429_s19, 512  ;;  %p431_p10 = scmp.lt.s32.totalorder %s168_s8, %s429_s19 }
  0x1a   : > { %p426_p6 = pnand %p424_p5, %p412_p3  ;;  %p432_p12 = scmp.lt.s32.totalorder %s430_s21, %s423_s11 }
  0x1c   : > { %p427_p7 = pneg %p426_p6  ;;  %p433_p4 = por %p432_p12, %p431_p10 }
  0x1e   : > { %p434_p13 = pnand %p433_p4, %p427_p7 }
  0x20   : > { %437 = shalt.err (!%p434_p13)
}
  0x21   : > { %353 = dma.hbm_to_vmem [thread:$0]  (!%p614_p0), %s165_s6, 256, %s168_s8, %s154_s10  }
  0x22   : > { %p173_p11 = pnand %p336_p1, %p172_p2 }
  0x23   : > { %s629_s22 = sand.u32 (!%p173_p11), 1, %s502_s13  }
  0x24   : > { %176 = sbr.rel (%p173_p11) target bundleno = 187 (0xbb), region = 32  ;;  %s337_s23 = sshll.u32 (!%p173_p11), %s629_s22, 4 }
  0x25   : > { %s179_s28 = scalar_lea.sflag (!%p173_p11), [#allocation3], %s629_s22  ;;  %s182_s29 = scalar_lea.vmem (!%p173_p11), [#allocation2], %s337_s23 }
  0x29   : > { %489 = dma.done.wait (%p590_p8), %s179_s28, 256  }
  0x2a   : > { %491 = vsyncadd (%p590_p8), %s179_s28, 4294967040  ;;  %v521_v0 = vmov 0   ;;  %v209_v1 = vld [vmem:[%s690_s1] sm:$0xff]  ;;  %v208_v5 = vld [vmem:[%s182_s29 + $0x8] sm:$0xff]  ;;  %s345_s7 = sshll.u32 %s510_s15, 8  ;;  %s204_s24 = scalar_lea.vmem [#allocation5], %s337_s23 }
  0x2b   : > { %409 = vset.pattern.permute.xlu0 %v521_v0  ;;  %v217_v2 = vld [vmem:[%s691_s2] sm:$0xff]  ;;  %s245_s8 = sshll.u32 %s204_s24, 4  ;;  %vm226_vm0 = vcmask 588800   ;;  %s647_s11 = scalar_lea.hbm %s692_s3, %s345_s7  ;;  %s246_s8 = int_to_ptr.vmem [resolvable:$true] %s245_s8 }
  0x2c   : > { %212 = vperm.xlu0 %409, %v209_v1   ;;  %v207_v4 = vld [vmem:[%s182_s29] sm:$0xff]  ;;  %s229_s18 = scalar_lea.sflag [#allocation4], %s629_s22  ;;  %s438_s19 = scalar_lea.vmem %s246_s8, 256 }
  0x2d   : > { %p439_p8 = scmp.ne.s32.totalorder %s246_s8, %s438_s19  ;;  %s522_s15 = smov [#allocation5]  }
  0x2e   : > { %s442_s21 = sshll.u32 %s522_s15, 4  ;;  %s443_s21 = int_to_ptr.vmem [resolvable:$false] %s442_s21 }
  0x2f   : > { %p440_p11 = pnand %p439_p8, %p594_p9  ;;  %s444_s23 = scalar_lea.vmem %s443_s21, 512 }
  0x30   : > { %220 = vperm.xlu0 %409, %v217_v2   ;;  %p445_p0 = scmp.lt.s32.totalorder %s246_s8, %s443_s21  ;;  %p446_p1 = scmp.lt.s32.totalorder %s444_s23, %s438_s19 }
  0x31   : > { %p441_p12 = pneg %p440_p11 }
  0x32   : > { %p447_p2 = por %p446_p1, %p445_p0 }
  0x34   : > { %p448_p3 = pnand %p447_p2, %p441_p12 }
  0xa7   : > { %v213_v3 = vpop.permute.xlu0 %212 }
  0xa8   : > { %v215_v6 = vmul.f32 %v213_v3, %v207_v4  ;;  %v216_v7 = vmul.f32 %v213_v3, %v208_v5 }
  0xab   : > { %v221_v8 = vpop.permute.xlu0 %220 }
  0xac   : > { %v223_v9 = vadd.f32 %v221_v8, %v215_v6  ;;  %v224_v10 = vadd.f32 %v221_v8, %v216_v7 }
  0xae   : > { %225 = vst [vmem:[%s204_s24] sm:$0xff] %v223_v9  ;;  %227 = vst.msk [vmem:[%s204_s24 + $0x8] sm:$0xff] %vm226_vm0, %v224_v10 }
  0xaf   : > { %451 = shalt.err (!%p448_p3)
}
  0xb0   : > { %s452_s28 = scalar_lea.hbm %s647_s11, 256  ;;  %s456_s30 = scalar_lea.hbm %s692_s3, 512 }
  0xb1   : > { %p453_p5 = scmp.ne.s32.totalorder %s647_s11, %s452_s28  ;;  %p457_p10 = scmp.lt.s32.totalorder %s647_s11, %s692_s3 }
  0xb2   : > { %p458_p4 = scmp.lt.s32.totalorder %s456_s30, %s452_s28 }
  0xb3   : > { %p454_p6 = pnand %p453_p5, %p594_p9 }
  0xb4   : > { %p459_p13 = por %p458_p4, %p457_p10 }
  0xb5   : > { %p455_p7 = pneg %p454_p6 }
  0xb7   : > { %p460_p8 = pnand %p459_p13, %p455_p7 }
  0xb9   : > { %463 = shalt.err (!%p460_p8)
}
  0xba   : > { %348 = dma.vmem_to_hbm [thread:$0]  (%p594_p9), %s246_s8, 256, %s647_s11, %s229_s18  }
  0xbb PF: > { %s257_s6 = sand.u32 1, %s498_s12   ;;  %p698_p11 = scmp.ne.s32.totalorder %s696_s27, 0 }
  0xbc   : > { %p699_p12 = scmp.ge.s32.totalorder %s518_s17, 2  ;;  %s258_s7 = scalar_lea.sflag [#allocation4], %s257_s6 }
  0xbe   : > { %p355_p0 = pnand %p699_p12, %p698_p11 }
  0xc0   : > { %p356_p1 = pneg %p355_p0 }
  0xc2   : > { %493 = dma.done.wait (%p356_p1), %s258_s7, 256  }
  0xc3   : > { %495 = vsyncadd (%p356_p1), %s258_s7, 4294967040  ;;  %s19_s17 = sadd.s32 1, %s518_s17   ;;  %s700_s12 = smov %s502_s13 }
  0xc4   : > { %p16_p2 = scmp.ge.s32.totalorder %s19_s17, 4   ;;  %s701_s13 = smov %s506_s14 }
  0xc5   : > { %s702_s14 = smov %s599_s26  ;;  %s703_s15 = smov %s514_s16 }
  0xc6   : > { %s704_s16 = smov %s706_s20  ;;  %18 = sbr.rel (!%p16_p2) target bundleno = 6 (0x6), region = 77 }
  0xcb   :  { %263 = vsyncpa [#allocation3], 1 }
  0xcc   :  { %265 = vsyncpa [#allocation3 + $0x1], 1 }
  0xcd   :  { %266 = vsyncpa [#allocation4], 1 }
  0xce   :  { %268 = vsyncpa [#allocation4 + $0x1], 1 }

</bundles_post_ra>
